<compile_context>
chip_gen: v5e
topology: v5e:2x2
jax: 0.10.0
libtpu: 0.0.40
codegen_flags: <defaults>
</compile_context>

<pallas_src>
import jax
import jax.numpy as jnp
from jax.experimental import pallas as pl
from jax.experimental.pallas import tpu as pltpu

_SUBLANES = 8


def _lstm_kernel(x_ref, wih_ref, whh_ref, b_ref, hall_ref, zx_scr, h_scr, c_scr):
    """x_ref:    (T*Bp, I)   bf16  time-major, batch padded to Bp (multiple of 8)
       wih_ref:  (I, 4H)     bf16
       whh_ref:  (H, 4H)     bf16
       b_ref:    (1, 4H)     f32   (b_ih + b_hh)
       hall_ref: (T*Bp, H)   f32   all hidden states (kernel output, lane-dense on H)
       zx_scr:   (T*Bp, 4H)  f32   pre-computed input projections
       h_scr/c_scr: (Bp, H)  f32   recurrent state."""
    TB = x_ref.shape[0]
    Bp, H = h_scr.shape
    T = TB // Bp

    # ---- (1) Input projection for every timestep in ONE MXU matmul, bias folded in.
    zx_scr[...] = (
        jax.lax.dot_general(
            x_ref[...], wih_ref[...], (((1,), (0,)), ((), ())),
            preferred_element_type=jnp.float32)
        + b_ref[...]
    )

    # ---- (2) Serial recurrence. Loop-invariant weight read hoisted out of the loop.
    whh = whh_ref[...]                                   # (H, 4H) bf16
    h_scr[...] = jnp.zeros_like(h_scr)
    c_scr[...] = jnp.zeros_like(c_scr)

    def step(t, carry):
        row = pl.multiple_of(t * Bp, _SUBLANES)          # sublane-aligned offset
        h = h_scr[...]
        c = c_scr[...]

        z = zx_scr[pl.ds(row, Bp), :] + jnp.dot(
            h.astype(jnp.bfloat16), whh, preferred_element_type=jnp.float32)

        # PyTorch gate order [i, f, g, o]; gate/cell math kept in f32.
        i_g = jax.nn.sigmoid(z[:, 0 * H:1 * H])
        f_g = jax.nn.sigmoid(z[:, 1 * H:2 * H])
        g_g = jnp.tanh(z[:, 2 * H:3 * H])
        o_g = jax.nn.sigmoid(z[:, 3 * H:4 * H])

        c_new = f_g * c + i_g * g_g
        h_new = o_g * jnp.tanh(c_new)

        c_scr[...] = c_new
        h_scr[...] = h_new
        hall_ref[pl.ds(row, Bp), :] = h_new
        return carry

    # Fully unrolled: gives the LLO scheduler visibility to overlap step t+1's
    # zx load / EUP gate work with step t's MXU tail.
    jax.lax.fori_loop(0, T, step, 0, unroll=True)


def _round_up(n, m):
    return ((n + m - 1) // m) * m


@jax.jit
def lstm_decoder_forward(x, params):
    """x: (B, T, I) float32 (batch_first, like the PyTorch module).
       params: (w_ih (4H,I), w_hh (4H,H), b_ih (4H,), b_hh (4H,), w_fc (1,H), b_fc (1,)).
       Returns (B, T, 1) float32."""
    w_ih, w_hh, b_ih, b_hh, w_fc, b_fc = params
    B, T, I = x.shape
    H = w_hh.shape[1]
    Bp = _round_up(max(B, _SUBLANES), _SUBLANES)

    # Layout glue (cheap XLA ops on tiny tensors): time-major, batch padded to a
    # sublane multiple, flattened so every kernel operand is a plain 2-D tile.
    x_tb = jnp.transpose(x.astype(jnp.float32), (1, 0, 2))           # (T, B, I)
    x_tb = jnp.pad(x_tb, ((0, 0), (0, Bp - B), (0, 0)))              # (T, Bp, I)
    x2 = x_tb.reshape(T * Bp, I).astype(jnp.bfloat16)                # (T*Bp, I)

    wih_t = jnp.asarray(w_ih, jnp.float32).T.astype(jnp.bfloat16)    # (I, 4H)
    whh_t = jnp.asarray(w_hh, jnp.float32).T.astype(jnp.bfloat16)    # (H, 4H)
    b = (jnp.asarray(b_ih, jnp.float32)
         + jnp.asarray(b_hh, jnp.float32)).reshape(1, 4 * H)         # (1, 4H)

    h_all = pl.pallas_call(
        _lstm_kernel,
        out_shape=jax.ShapeDtypeStruct((T * Bp, H), jnp.float32),
        in_specs=[pl.BlockSpec(memory_space=pltpu.MemorySpace.VMEM)] * 4,
        out_specs=pl.BlockSpec(memory_space=pltpu.MemorySpace.VMEM),
        scratch_shapes=[
            pltpu.VMEM((T * Bp, 4 * H), jnp.float32),   # zx: input projections
            pltpu.VMEM((Bp, H), jnp.float32),           # h state
            pltpu.VMEM((Bp, H), jnp.float32),           # c state
        ],
    )(x2, wih_t, whh_t, b)
    # Note: for large B/T (esp. v7x, 64 MiB VMEM), add a ('parallel',) batch-tile
    # grid axis and stream zx over T chunks; not needed at these shapes.

    # Final Linear(H, 1) done lane-dense outside the kernel, then back to batch_first.
    h_all = h_all.reshape(T, Bp, H)[:, :B, :]                        # (T, B, H)
    h_bt = jnp.transpose(h_all, (1, 0, 2))                           # (B, T, H)
    out = h_bt @ jnp.asarray(w_fc, jnp.float32).T + jnp.asarray(b_fc, jnp.float32)
    return out                                                       # (B, T, 1)


def _reference_forward_f32(x, params):
    """Pure-f32 JAX reference matching PyTorch nn.LSTM(batch_first) + nn.Linear."""
    w_ih, w_hh, b_ih, b_hh, w_fc, b_fc = params
    B, T, I = x.shape
    H = w_hh.shape[1]
    h = jnp.zeros((B, H), jnp.float32)
    c = jnp.zeros((B, H), jnp.float32)
    outs = []
    for t in range(T):
        z = x[:, t, :] @ w_ih.T + h @ w_hh.T + b_ih + b_hh
        i_g = jax.nn.sigmoid(z[:, 0 * H:1 * H])
        f_g = jax.nn.sigmoid(z[:, 1 * H:2 * H])
        g_g = jnp.tanh(z[:, 2 * H:3 * H])
        o_g = jax.nn.sigmoid(z[:, 3 * H:4 * H])
        c = f_g * c + i_g * g_g
        h = o_g * jnp.tanh(c)
        outs.append(h @ w_fc.T + b_fc)
    return jnp.stack(outs, axis=1)                                   # (B, T, 1)


def _reference_forward_bf16(x, params):
    """Mirrors the kernel's numerics: bf16 MXU inputs, f32 accumulation/gates."""
    w_ih, w_hh, b_ih, b_hh, w_fc, b_fc = params
    B, T, I = x.shape
    H = w_hh.shape[1]
    wih = jnp.asarray(w_ih, jnp.float32).T.astype(jnp.bfloat16)
    whh = jnp.asarray(w_hh, jnp.float32).T.astype(jnp.bfloat16)
    bias = (jnp.asarray(b_ih, jnp.float32) + jnp.asarray(b_hh, jnp.float32))
    xb = x.astype(jnp.bfloat16)
    h = jnp.zeros((B, H), jnp.float32)
    c = jnp.zeros((B, H), jnp.float32)
    hs = []
    for t in range(T):
        zx = jnp.dot(xb[:, t, :], wih, preferred_element_type=jnp.float32) + bias
        z = zx + jnp.dot(h.astype(jnp.bfloat16), whh,
                         preferred_element_type=jnp.float32)
        i_g = jax.nn.sigmoid(z[:, 0 * H:1 * H])
        f_g = jax.nn.sigmoid(z[:, 1 * H:2 * H])
        g_g = jnp.tanh(z[:, 2 * H:3 * H])
        o_g = jax.nn.sigmoid(z[:, 3 * H:4 * H])
        c = f_g * c + i_g * g_g
        h = o_g * jnp.tanh(c)
        hs.append(h)
    h_all = jnp.stack(hs, axis=1)                                    # (B, T, H)
    return h_all @ jnp.asarray(w_fc, jnp.float32).T + jnp.asarray(b_fc, jnp.float32)


def init_params(key, input_size, hidden_size):
    """Deterministic synthetic init (uniform +-1/sqrt(H), like PyTorch LSTM)."""
    k = jax.random.split(key, 6)
    bound = 1.0 / jnp.sqrt(hidden_size)
    w_ih = jax.random.uniform(k[0], (4 * hidden_size, input_size),
                              jnp.float32, -bound, bound)
    w_hh = jax.random.uniform(k[1], (4 * hidden_size, hidden_size),
                              jnp.float32, -bound, bound)
    b_ih = jax.random.uniform(k[2], (4 * hidden_size,), jnp.float32, -bound, bound)
    b_hh = jax.random.uniform(k[3], (4 * hidden_size,), jnp.float32, -bound, bound)
    w_fc = jax.random.uniform(k[4], (1, hidden_size), jnp.float32, -bound, bound)
    b_fc = jax.random.uniform(k[5], (1,), jnp.float32, -bound, bound)
    return (w_ih, w_hh, b_ih, b_hh, w_fc, b_fc)


if __name__ == "__main__":
    B, T, I, H = 2, 8, 4, 32   # batch, seq, input_size, hidden_size

    key = jax.random.PRNGKey(0)
    kx, kp = jax.random.split(key)
    x = jax.random.normal(kx, (B, T, I), jnp.float32)
    params = init_params(kp, I, H)

    out = jax.block_until_ready(lstm_decoder_forward(x, params))
    assert out.shape == (B, T, 1)

    ref_mirror = _reference_forward_bf16(x, params)   # same numerics as the kernel
    ref_f32 = _reference_forward_f32(x, params)       # PyTorch-faithful f32 path
    assert jnp.allclose(out, ref_mirror, atol=2e-3, rtol=2e-3), "mismatch vs bf16 reference"
    assert jnp.allclose(out, ref_f32, atol=5e-2, rtol=5e-2), "mismatch vs f32 reference"

    print("KERNEL_OK")
</pallas_src>

<mosaic_0001>
module attributes {stable_mosaic.version = 11 : i64} {
  func.func @_lstm_kernel(%arg0: memref<64x4xbf16, #tpu.memory_space<vmem>>, %arg1: memref<4x128xbf16, #tpu.memory_space<vmem>>, %arg2: memref<32x128xbf16, #tpu.memory_space<vmem>>, %arg3: memref<1x128xf32, #tpu.memory_space<vmem>>, %arg4: memref<64x32xf32, #tpu.memory_space<vmem>>, %arg5: memref<64x128xf32, #tpu.memory_space<vmem>>, %arg6: memref<8x32xf32, #tpu.memory_space<vmem>>, %arg7: memref<8x32xf32, #tpu.memory_space<vmem>>) attributes {dimension_semantics = [], scalar_prefetch = 0 : i64, scratch_operands = 3 : i64, tpu.core_type = #tpu.core_type<tc>} {
    %c0 = arith.constant 0 : index
    %c0_0 = arith.constant 0 : index
    %0 = vector.load %arg0[%c0, %c0_0] : memref<64x4xbf16, #tpu.memory_space<vmem>>, vector<64x4xbf16>
    %c0_1 = arith.constant 0 : index
    %c0_2 = arith.constant 0 : index
    %1 = vector.load %arg1[%c0_1, %c0_2] : memref<4x128xbf16, #tpu.memory_space<vmem>>, vector<4x128xbf16>
    %cst = arith.constant dense<0.000000e+00> : vector<64x128xf32>
    %2 = tpu.matmul %0, %1, %cst {dimension_numbers = #tpu.dot_dimension_numbers<[1], [0], [0], [1], [0, 0, 1, 1], [], []>} : vector<64x4xbf16>, vector<4x128xbf16>, vector<64x128xf32> -> vector<64x128xf32>
    %c0_3 = arith.constant 0 : index
    %c0_4 = arith.constant 0 : index
    %3 = vector.load %arg3[%c0_3, %c0_4] : memref<1x128xf32, #tpu.memory_space<vmem>>, vector<1x128xf32>
    %4 = vector.broadcast %3 : vector<1x128xf32> to vector<64x128xf32>
    %5 = arith.addf %2, %4 : vector<64x128xf32>
    %c0_5 = arith.constant 0 : index
    %c0_6 = arith.constant 0 : index
    %6 = vector.load %arg5[%c0_5, %c0_6] : memref<64x128xf32, #tpu.memory_space<vmem>>, vector<64x128xf32>
    tpu.vector_store %arg5[%c0_5, %c0_6], %5 {strides = array<i32>} : memref<64x128xf32, #tpu.memory_space<vmem>>, vector<64x128xf32>,
    %c0_7 = arith.constant 0 : index
    %c0_8 = arith.constant 0 : index
    %7 = vector.load %arg2[%c0_7, %c0_8] : memref<32x128xbf16, #tpu.memory_space<vmem>>, vector<32x128xbf16>
    %cst_9 = arith.constant 0.000000e+00 : f32
    %8 = vector.broadcast %cst_9 : f32 to vector<8x32xf32>
    %c0_10 = arith.constant 0 : index
    %c0_11 = arith.constant 0 : index
    %9 = vector.load %arg6[%c0_10, %c0_11] : memref<8x32xf32, #tpu.memory_space<vmem>>, vector<8x32xf32>
    tpu.vector_store %arg6[%c0_10, %c0_11], %8 {strides = array<i32>} : memref<8x32xf32, #tpu.memory_space<vmem>>, vector<8x32xf32>,
    %cst_12 = arith.constant 0.000000e+00 : f32
    %10 = vector.broadcast %cst_12 : f32 to vector<8x32xf32>
    %c0_13 = arith.constant 0 : index
    %c0_14 = arith.constant 0 : index
    %11 = vector.load %arg7[%c0_13, %c0_14] : memref<8x32xf32, #tpu.memory_space<vmem>>, vector<8x32xf32>
    tpu.vector_store %arg7[%c0_13, %c0_14], %10 {strides = array<i32>} : memref<8x32xf32, #tpu.memory_space<vmem>>, vector<8x32xf32>,
    %c0_i32 = arith.constant 0 : i32
    %c8_i32 = arith.constant 8 : i32
    %12 = arith.muli %c0_i32, %c8_i32 : i32
    %13 = tpu.assume_multiple %12, 8 : i32
    %c0_15 = arith.constant 0 : index
    %c0_16 = arith.constant 0 : index
    %14 = vector.load %arg6[%c0_15, %c0_16] : memref<8x32xf32, #tpu.memory_space<vmem>>, vector<8x32xf32>
    %c0_17 = arith.constant 0 : index
    %c0_18 = arith.constant 0 : index
    %15 = vector.load %arg7[%c0_17, %c0_18] : memref<8x32xf32, #tpu.memory_space<vmem>>, vector<8x32xf32>
    %16 = arith.index_cast %13 : i32 to index
    %c0_19 = arith.constant 0 : index
    %17 = vector.load %arg5[%16, %c0_19] : memref<64x128xf32, #tpu.memory_space<vmem>>, vector<8x128xf32>
    %18 = arith.truncf %14 : vector<8x32xf32> to vector<8x32xbf16>
    %cst_20 = arith.constant dense<0.000000e+00> : vector<8x128xf32>
    %19 = tpu.matmul %18, %7, %cst_20 {dimension_numbers = #tpu.dot_dimension_numbers<[1], [0], [0], [1], [0, 0, 1, 1], [], []>} : vector<8x32xbf16>, vector<32x128xbf16>, vector<8x128xf32> -> vector<8x128xf32>
    %20 = arith.addf %17, %19 : vector<8x128xf32>
    %21 = vector.extract_strided_slice %20 {offsets = [0, 0], sizes = [8, 32], strides = [1, 1]} : vector<8x128xf32> to vector<8x32xf32>
    %22 = arith.negf %21 : vector<8x32xf32>
    %23 = math.exp %22 : vector<8x32xf32>
    %cst_21 = arith.constant 1.000000e+00 : f32
    %24 = vector.broadcast %cst_21 : f32 to vector<8x32xf32>
    %25 = arith.addf %24, %23 : vector<8x32xf32>
    %26 = arith.divf %24, %25 : vector<8x32xf32>
    %27 = vector.extract_strided_slice %20 {offsets = [0, 32], sizes = [8, 32], strides = [1, 1]} : vector<8x128xf32> to vector<8x32xf32>
    %28 = arith.negf %27 : vector<8x32xf32>
    %29 = math.exp %28 : vector<8x32xf32>
    %cst_22 = arith.constant 1.000000e+00 : f32
    %30 = vector.broadcast %cst_22 : f32 to vector<8x32xf32>
    %31 = arith.addf %30, %29 : vector<8x32xf32>
    %32 = arith.divf %30, %31 : vector<8x32xf32>
    %33 = vector.extract_strided_slice %20 {offsets = [0, 64], sizes = [8, 32], strides = [1, 1]} : vector<8x128xf32> to vector<8x32xf32>
    %34 = math.tanh %33 : vector<8x32xf32>
    %35 = vector.extract_strided_slice %20 {offsets = [0, 96], sizes = [8, 32], strides = [1, 1]} : vector<8x128xf32> to vector<8x32xf32>
    %36 = arith.negf %35 : vector<8x32xf32>
    %37 = math.exp %36 : vector<8x32xf32>
    %cst_23 = arith.constant 1.000000e+00 : f32
    %38 = vector.broadcast %cst_23 : f32 to vector<8x32xf32>
    %39 = arith.addf %38, %37 : vector<8x32xf32>
    %40 = arith.divf %38, %39 : vector<8x32xf32>
    %41 = arith.mulf %32, %15 : vector<8x32xf32>
    %42 = arith.mulf %26, %34 : vector<8x32xf32>
    %43 = arith.addf %41, %42 : vector<8x32xf32>
    %44 = math.tanh %43 : vector<8x32xf32>
    %45 = arith.mulf %40, %44 : vector<8x32xf32>
    %c0_24 = arith.constant 0 : index
    %c0_25 = arith.constant 0 : index
    %46 = vector.load %arg7[%c0_24, %c0_25] : memref<8x32xf32, #tpu.memory_space<vmem>>, vector<8x32xf32>
    tpu.vector_store %arg7[%c0_24, %c0_25], %43 {strides = array<i32>} : memref<8x32xf32, #tpu.memory_space<vmem>>, vector<8x32xf32>,
    %c0_26 = arith.constant 0 : index
    %c0_27 = arith.constant 0 : index
    %47 = vector.load %arg6[%c0_26, %c0_27] : memref<8x32xf32, #tpu.memory_space<vmem>>, vector<8x32xf32>
    tpu.vector_store %arg6[%c0_26, %c0_27], %45 {strides = array<i32>} : memref<8x32xf32, #tpu.memory_space<vmem>>, vector<8x32xf32>,
    %48 = arith.index_cast %13 : i32 to index
    %c0_28 = arith.constant 0 : index
    %49 = vector.load %arg4[%48, %c0_28] : memref<64x32xf32, #tpu.memory_space<vmem>>, vector<8x32xf32>
    tpu.vector_store %arg4[%48, %c0_28], %45 {strides = array<i32>} : memref<64x32xf32, #tpu.memory_space<vmem>>, vector<8x32xf32>,
    %c1_i32 = arith.constant 1 : i32
    %c8_i32_29 = arith.constant 8 : i32
    %50 = arith.muli %c1_i32, %c8_i32_29 : i32
    %51 = tpu.assume_multiple %50, 8 : i32
    %c0_30 = arith.constant 0 : index
    %c0_31 = arith.constant 0 : index
    %52 = vector.load %arg6[%c0_30, %c0_31] : memref<8x32xf32, #tpu.memory_space<vmem>>, vector<8x32xf32>
    %c0_32 = arith.constant 0 : index
    %c0_33 = arith.constant 0 : index
    %53 = vector.load %arg7[%c0_32, %c0_33] : memref<8x32xf32, #tpu.memory_space<vmem>>, vector<8x32xf32>
    %54 = arith.index_cast %51 : i32 to index
    %c0_34 = arith.constant 0 : index
    %55 = vector.load %arg5[%54, %c0_34] : memref<64x128xf32, #tpu.memory_space<vmem>>, vector<8x128xf32>
    %56 = arith.truncf %52 : vector<8x32xf32> to vector<8x32xbf16>
    %cst_35 = arith.constant dense<0.000000e+00> : vector<8x128xf32>
    %57 = tpu.matmul %56, %7, %cst_35 {dimension_numbers = #tpu.dot_dimension_numbers<[1], [0], [0], [1], [0, 0, 1, 1], [], []>} : vector<8x32xbf16>, vector<32x128xbf16>, vector<8x128xf32> -> vector<8x128xf32>
    %58 = arith.addf %55, %57 : vector<8x128xf32>
    %59 = vector.extract_strided_slice %58 {offsets = [0, 0], sizes = [8, 32], strides = [1, 1]} : vector<8x128xf32> to vector<8x32xf32>
    %60 = arith.negf %59 : vector<8x32xf32>
    %61 = math.exp %60 : vector<8x32xf32>
    %cst_36 = arith.constant 1.000000e+00 : f32
    %62 = vector.broadcast %cst_36 : f32 to vector<8x32xf32>
    %63 = arith.addf %62, %61 : vector<8x32xf32>
    %64 = arith.divf %62, %63 : vector<8x32xf32>
    %65 = vector.extract_strided_slice %58 {offsets = [0, 32], sizes = [8, 32], strides = [1, 1]} : vector<8x128xf32> to vector<8x32xf32>
    %66 = arith.negf %65 : vector<8x32xf32>
    %67 = math.exp %66 : vector<8x32xf32>
    %cst_37 = arith.constant 1.000000e+00 : f32
    %68 = vector.broadcast %cst_37 : f32 to vector<8x32xf32>
    %69 = arith.addf %68, %67 : vector<8x32xf32>
    %70 = arith.divf %68, %69 : vector<8x32xf32>
    %71 = vector.extract_strided_slice %58 {offsets = [0, 64], sizes = [8, 32], strides = [1, 1]} : vector<8x128xf32> to vector<8x32xf32>
    %72 = math.tanh %71 : vector<8x32xf32>
    %73 = vector.extract_strided_slice %58 {offsets = [0, 96], sizes = [8, 32], strides = [1, 1]} : vector<8x128xf32> to vector<8x32xf32>
    %74 = arith.negf %73 : vector<8x32xf32>
    %75 = math.exp %74 : vector<8x32xf32>
    %cst_38 = arith.constant 1.000000e+00 : f32
    %76 = vector.broadcast %cst_38 : f32 to vector<8x32xf32>
    %77 = arith.addf %76, %75 : vector<8x32xf32>
    %78 = arith.divf %76, %77 : vector<8x32xf32>
    %79 = arith.mulf %70, %53 : vector<8x32xf32>
    %80 = arith.mulf %64, %72 : vector<8x32xf32>
    %81 = arith.addf %79, %80 : vector<8x32xf32>
    %82 = math.tanh %81 : vector<8x32xf32>
    %83 = arith.mulf %78, %82 : vector<8x32xf32>
    %c0_39 = arith.constant 0 : index
    %c0_40 = arith.constant 0 : index
    %84 = vector.load %arg7[%c0_39, %c0_40] : memref<8x32xf32, #tpu.memory_space<vmem>>, vector<8x32xf32>
    tpu.vector_store %arg7[%c0_39, %c0_40], %81 {strides = array<i32>} : memref<8x32xf32, #tpu.memory_space<vmem>>, vector<8x32xf32>,
    %c0_41 = arith.constant 0 : index
    %c0_42 = arith.constant 0 : index
    %85 = vector.load %arg6[%c0_41, %c0_42] : memref<8x32xf32, #tpu.memory_space<vmem>>, vector<8x32xf32>
    tpu.vector_store %arg6[%c0_41, %c0_42], %83 {strides = array<i32>} : memref<8x32xf32, #tpu.memory_space<vmem>>, vector<8x32xf32>,
    %86 = arith.index_cast %51 : i32 to index
    %c0_43 = arith.constant 0 : index
    %87 = vector.load %arg4[%86, %c0_43] : memref<64x32xf32, #tpu.memory_space<vmem>>, vector<8x32xf32>
    tpu.vector_store %arg4[%86, %c0_43], %83 {strides = array<i32>} : memref<64x32xf32, #tpu.memory_space<vmem>>, vector<8x32xf32>,
    %c2_i32 = arith.constant 2 : i32
    %c8_i32_44 = arith.constant 8 : i32
    %88 = arith.muli %c2_i32, %c8_i32_44 : i32
    %89 = tpu.assume_multiple %88, 8 : i32
    %c0_45 = arith.constant 0 : index
    %c0_46 = arith.constant 0 : index
    %90 = vector.load %arg6[%c0_45, %c0_46] : memref<8x32xf32, #tpu.memory_space<vmem>>, vector<8x32xf32>
    %c0_47 = arith.constant 0 : index
    %c0_48 = arith.constant 0 : index
    %91 = vector.load %arg7[%c0_47, %c0_48] : memref<8x32xf32, #tpu.memory_space<vmem>>, vector<8x32xf32>
    %92 = arith.index_cast %89 : i32 to index
    %c0_49 = arith.constant 0 : index
    %93 = vector.load %arg5[%92, %c0_49] : memref<64x128xf32, #tpu.memory_space<vmem>>, vector<8x128xf32>
    %94 = arith.truncf %90 : vector<8x32xf32> to vector<8x32xbf16>
    %cst_50 = arith.constant dense<0.000000e+00> : vector<8x128xf32>
    %95 = tpu.matmul %94, %7, %cst_50 {dimension_numbers = #tpu.dot_dimension_numbers<[1], [0], [0], [1], [0, 0, 1, 1], [], []>} : vector<8x32xbf16>, vector<32x128xbf16>, vector<8x128xf32> -> vector<8x128xf32>
    %96 = arith.addf %93, %95 : vector<8x128xf32>
    %97 = vector.extract_strided_slice %96 {offsets = [0, 0], sizes = [8, 32], strides = [1, 1]} : vector<8x128xf32> to vector<8x32xf32>
    %98 = arith.negf %97 : vector<8x32xf32>
    %99 = math.exp %98 : vector<8x32xf32>
    %cst_51 = arith.constant 1.000000e+00 : f32
    %100 = vector.broadcast %cst_51 : f32 to vector<8x32xf32>
    %101 = arith.addf %100, %99 : vector<8x32xf32>
    %102 = arith.divf %100, %101 : vector<8x32xf32>
    %103 = vector.extract_strided_slice %96 {offsets = [0, 32], sizes = [8, 32], strides = [1, 1]} : vector<8x128xf32> to vector<8x32xf32>
    %104 = arith.negf %103 : vector<8x32xf32>
    %105 = math.exp %104 : vector<8x32xf32>
    %cst_52 = arith.constant 1.000000e+00 : f32
    %106 = vector.broadcast %cst_52 : f32 to vector<8x32xf32>
    %107 = arith.addf %106, %105 : vector<8x32xf32>
    %108 = arith.divf %106, %107 : vector<8x32xf32>
    %109 = vector.extract_strided_slice %96 {offsets = [0, 64], sizes = [8, 32], strides = [1, 1]} : vector<8x128xf32> to vector<8x32xf32>
    %110 = math.tanh %109 : vector<8x32xf32>
    %111 = vector.extract_strided_slice %96 {offsets = [0, 96], sizes = [8, 32], strides = [1, 1]} : vector<8x128xf32> to vector<8x32xf32>
    %112 = arith.negf %111 : vector<8x32xf32>
    %113 = math.exp %112 : vector<8x32xf32>
    %cst_53 = arith.constant 1.000000e+00 : f32
    %114 = vector.broadcast %cst_53 : f32 to vector<8x32xf32>
    %115 = arith.addf %114, %113 : vector<8x32xf32>
    %116 = arith.divf %114, %115 : vector<8x32xf32>
    %117 = arith.mulf %108, %91 : vector<8x32xf32>
    %118 = arith.mulf %102, %110 : vector<8x32xf32>
    %119 = arith.addf %117, %118 : vector<8x32xf32>
    %120 = math.tanh %119 : vector<8x32xf32>
    %121 = arith.mulf %116, %120 : vector<8x32xf32>
    %c0_54 = arith.constant 0 : index
    %c0_55 = arith.constant 0 : index
    %122 = vector.load %arg7[%c0_54, %c0_55] : memref<8x32xf32, #tpu.memory_space<vmem>>, vector<8x32xf32>
    tpu.vector_store %arg7[%c0_54, %c0_55], %119 {strides = array<i32>} : memref<8x32xf32, #tpu.memory_space<vmem>>, vector<8x32xf32>,
    %c0_56 = arith.constant 0 : index
    %c0_57 = arith.constant 0 : index
    %123 = vector.load %arg6[%c0_56, %c0_57] : memref<8x32xf32, #tpu.memory_space<vmem>>, vector<8x32xf32>
    tpu.vector_store %arg6[%c0_56, %c0_57], %121 {strides = array<i32>} : memref<8x32xf32, #tpu.memory_space<vmem>>, vector<8x32xf32>,
    %124 = arith.index_cast %89 : i32 to index
    %c0_58 = arith.constant 0 : index
    %125 = vector.load %arg4[%124, %c0_58] : memref<64x32xf32, #tpu.memory_space<vmem>>, vector<8x32xf32>
    tpu.vector_store %arg4[%124, %c0_58], %121 {strides = array<i32>} : memref<64x32xf32, #tpu.memory_space<vmem>>, vector<8x32xf32>,
    %c3_i32 = arith.constant 3 : i32
    %c8_i32_59 = arith.constant 8 : i32
    %126 = arith.muli %c3_i32, %c8_i32_59 : i32
    %127 = tpu.assume_multiple %126, 8 : i32
    %c0_60 = arith.constant 0 : index
    %c0_61 = arith.constant 0 : index
    %128 = vector.load %arg6[%c0_60, %c0_61] : memref<8x32xf32, #tpu.memory_space<vmem>>, vector<8x32xf32>
    %c0_62 = arith.constant 0 : index
    %c0_63 = arith.constant 0 : index
    %129 = vector.load %arg7[%c0_62, %c0_63] : memref<8x32xf32, #tpu.memory_space<vmem>>, vector<8x32xf32>
    %130 = arith.index_cast %127 : i32 to index
    %c0_64 = arith.constant 0 : index
    %131 = vector.load %arg5[%130, %c0_64] : memref<64x128xf32, #tpu.memory_space<vmem>>, vector<8x128xf32>
    %132 = arith.truncf %128 : vector<8x32xf32> to vector<8x32xbf16>
    %cst_65 = arith.constant dense<0.000000e+00> : vector<8x128xf32>
    %133 = tpu.matmul %132, %7, %cst_65 {dimension_numbers = #tpu.dot_dimension_numbers<[1], [0], [0], [1], [0, 0, 1, 1], [], []>} : vector<8x32xbf16>, vector<32x128xbf16>, vector<8x128xf32> -> vector<8x128xf32>
    %134 = arith.addf %131, %133 : vector<8x128xf32>
    %135 = vector.extract_strided_slice %134 {offsets = [0, 0], sizes = [8, 32], strides = [1, 1]} : vector<8x128xf32> to vector<8x32xf32>
    %136 = arith.negf %135 : vector<8x32xf32>
    %137 = math.exp %136 : vector<8x32xf32>
    %cst_66 = arith.constant 1.000000e+00 : f32
    %138 = vector.broadcast %cst_66 : f32 to vector<8x32xf32>
    %139 = arith.addf %138, %137 : vector<8x32xf32>
    %140 = arith.divf %138, %139 : vector<8x32xf32>
    %141 = vector.extract_strided_slice %134 {offsets = [0, 32], sizes = [8, 32], strides = [1, 1]} : vector<8x128xf32> to vector<8x32xf32>
    %142 = arith.negf %141 : vector<8x32xf32>
    %143 = math.exp %142 : vector<8x32xf32>
    %cst_67 = arith.constant 1.000000e+00 : f32
    %144 = vector.broadcast %cst_67 : f32 to vector<8x32xf32>
    %145 = arith.addf %144, %143 : vector<8x32xf32>
    %146 = arith.divf %144, %145 : vector<8x32xf32>
    %147 = vector.extract_strided_slice %134 {offsets = [0, 64], sizes = [8, 32], strides = [1, 1]} : vector<8x128xf32> to vector<8x32xf32>
    %148 = math.tanh %147 : vector<8x32xf32>
    %149 = vector.extract_strided_slice %134 {offsets = [0, 96], sizes = [8, 32], strides = [1, 1]} : vector<8x128xf32> to vector<8x32xf32>
    %150 = arith.negf %149 : vector<8x32xf32>
    %151 = math.exp %150 : vector<8x32xf32>
    %cst_68 = arith.constant 1.000000e+00 : f32
    %152 = vector.broadcast %cst_68 : f32 to vector<8x32xf32>
    %153 = arith.addf %152, %151 : vector<8x32xf32>
    %154 = arith.divf %152, %153 : vector<8x32xf32>
    %155 = arith.mulf %146, %129 : vector<8x32xf32>
    %156 = arith.mulf %140, %148 : vector<8x32xf32>
    %157 = arith.addf %155, %156 : vector<8x32xf32>
    %158 = math.tanh %157 : vector<8x32xf32>
    %159 = arith.mulf %154, %158 : vector<8x32xf32>
    %c0_69 = arith.constant 0 : index
    %c0_70 = arith.constant 0 : index
    %160 = vector.load %arg7[%c0_69, %c0_70] : memref<8x32xf32, #tpu.memory_space<vmem>>, vector<8x32xf32>
    tpu.vector_store %arg7[%c0_69, %c0_70], %157 {strides = array<i32>} : memref<8x32xf32, #tpu.memory_space<vmem>>, vector<8x32xf32>,
    %c0_71 = arith.constant 0 : index
    %c0_72 = arith.constant 0 : index
    %161 = vector.load %arg6[%c0_71, %c0_72] : memref<8x32xf32, #tpu.memory_space<vmem>>, vector<8x32xf32>
    tpu.vector_store %arg6[%c0_71, %c0_72], %159 {strides = array<i32>} : memref<8x32xf32, #tpu.memory_space<vmem>>, vector<8x32xf32>,
    %162 = arith.index_cast %127 : i32 to index
    %c0_73 = arith.constant 0 : index
    %163 = vector.load %arg4[%162, %c0_73] : memref<64x32xf32, #tpu.memory_space<vmem>>, vector<8x32xf32>
    tpu.vector_store %arg4[%162, %c0_73], %159 {strides = array<i32>} : memref<64x32xf32, #tpu.memory_space<vmem>>, vector<8x32xf32>,
    %c4_i32 = arith.constant 4 : i32
    %c8_i32_74 = arith.constant 8 : i32
    %164 = arith.muli %c4_i32, %c8_i32_74 : i32
    %165 = tpu.assume_multiple %164, 8 : i32
    %c0_75 = arith.constant 0 : index
    %c0_76 = arith.constant 0 : index
    %166 = vector.load %arg6[%c0_75, %c0_76] : memref<8x32xf32, #tpu.memory_space<vmem>>, vector<8x32xf32>
    %c0_77 = arith.constant 0 : index
    %c0_78 = arith.constant 0 : index
    %167 = vector.load %arg7[%c0_77, %c0_78] : memref<8x32xf32, #tpu.memory_space<vmem>>, vector<8x32xf32>
    %168 = arith.index_cast %165 : i32 to index
    %c0_79 = arith.constant 0 : index
    %169 = vector.load %arg5[%168, %c0_79] : memref<64x128xf32, #tpu.memory_space<vmem>>, vector<8x128xf32>
    %170 = arith.truncf %166 : vector<8x32xf32> to vector<8x32xbf16>
    %cst_80 = arith.constant dense<0.000000e+00> : vector<8x128xf32>
    %171 = tpu.matmul %170, %7, %cst_80 {dimension_numbers = #tpu.dot_dimension_numbers<[1], [0], [0], [1], [0, 0, 1, 1], [], []>} : vector<8x32xbf16>, vector<32x128xbf16>, vector<8x128xf32> -> vector<8x128xf32>
    %172 = arith.addf %169, %171 : vector<8x128xf32>
    %173 = vector.extract_strided_slice %172 {offsets = [0, 0], sizes = [8, 32], strides = [1, 1]} : vector<8x128xf32> to vector<8x32xf32>
    %174 = arith.negf %173 : vector<8x32xf32>
    %175 = math.exp %174 : vector<8x32xf32>
    %cst_81 = arith.constant 1.000000e+00 : f32
    %176 = vector.broadcast %cst_81 : f32 to vector<8x32xf32>
    %177 = arith.addf %176, %175 : vector<8x32xf32>
    %178 = arith.divf %176, %177 : vector<8x32xf32>
    %179 = vector.extract_strided_slice %172 {offsets = [0, 32], sizes = [8, 32], strides = [1, 1]} : vector<8x128xf32> to vector<8x32xf32>
    %180 = arith.negf %179 : vector<8x32xf32>
    %181 = math.exp %180 : vector<8x32xf32>
    %cst_82 = arith.constant 1.000000e+00 : f32
    %182 = vector.broadcast %cst_82 : f32 to vector<8x32xf32>
    %183 = arith.addf %182, %181 : vector<8x32xf32>
    %184 = arith.divf %182, %183 : vector<8x32xf32>
    %185 = vector.extract_strided_slice %172 {offsets = [0, 64], sizes = [8, 32], strides = [1, 1]} : vector<8x128xf32> to vector<8x32xf32>
    %186 = math.tanh %185 : vector<8x32xf32>
    %187 = vector.extract_strided_slice %172 {offsets = [0, 96], sizes = [8, 32], strides = [1, 1]} : vector<8x128xf32> to vector<8x32xf32>
    %188 = arith.negf %187 : vector<8x32xf32>
    %189 = math.exp %188 : vector<8x32xf32>
    %cst_83 = arith.constant 1.000000e+00 : f32
    %190 = vector.broadcast %cst_83 : f32 to vector<8x32xf32>
    %191 = arith.addf %190, %189 : vector<8x32xf32>
    %192 = arith.divf %190, %191 : vector<8x32xf32>
    %193 = arith.mulf %184, %167 : vector<8x32xf32>
    %194 = arith.mulf %178, %186 : vector<8x32xf32>
    %195 = arith.addf %193, %194 : vector<8x32xf32>
    %196 = math.tanh %195 : vector<8x32xf32>
    %197 = arith.mulf %192, %196 : vector<8x32xf32>
    %c0_84 = arith.constant 0 : index
    %c0_85 = arith.constant 0 : index
    %198 = vector.load %arg7[%c0_84, %c0_85] : memref<8x32xf32, #tpu.memory_space<vmem>>, vector<8x32xf32>
    tpu.vector_store %arg7[%c0_84, %c0_85], %195 {strides = array<i32>} : memref<8x32xf32, #tpu.memory_space<vmem>>, vector<8x32xf32>,
    %c0_86 = arith.constant 0 : index
    %c0_87 = arith.constant 0 : index
    %199 = vector.load %arg6[%c0_86, %c0_87] : memref<8x32xf32, #tpu.memory_space<vmem>>, vector<8x32xf32>
    tpu.vector_store %arg6[%c0_86, %c0_87], %197 {strides = array<i32>} : memref<8x32xf32, #tpu.memory_space<vmem>>, vector<8x32xf32>,
    %200 = arith.index_cast %165 : i32 to index
    %c0_88 = arith.constant 0 : index
    %201 = vector.load %arg4[%200, %c0_88] : memref<64x32xf32, #tpu.memory_space<vmem>>, vector<8x32xf32>
    tpu.vector_store %arg4[%200, %c0_88], %197 {strides = array<i32>} : memref<64x32xf32, #tpu.memory_space<vmem>>, vector<8x32xf32>,
    %c5_i32 = arith.constant 5 : i32
    %c8_i32_89 = arith.constant 8 : i32
    %202 = arith.muli %c5_i32, %c8_i32_89 : i32
    %203 = tpu.assume_multiple %202, 8 : i32
    %c0_90 = arith.constant 0 : index
    %c0_91 = arith.constant 0 : index
    %204 = vector.load %arg6[%c0_90, %c0_91] : memref<8x32xf32, #tpu.memory_space<vmem>>, vector<8x32xf32>
    %c0_92 = arith.constant 0 : index
    %c0_93 = arith.constant 0 : index
    %205 = vector.load %arg7[%c0_92, %c0_93] : memref<8x32xf32, #tpu.memory_space<vmem>>, vector<8x32xf32>
    %206 = arith.index_cast %203 : i32 to index
    %c0_94 = arith.constant 0 : index
    %207 = vector.load %arg5[%206, %c0_94] : memref<64x128xf32, #tpu.memory_space<vmem>>, vector<8x128xf32>
    %208 = arith.truncf %204 : vector<8x32xf32> to vector<8x32xbf16>
    %cst_95 = arith.constant dense<0.000000e+00> : vector<8x128xf32>
    %209 = tpu.matmul %208, %7, %cst_95 {dimension_numbers = #tpu.dot_dimension_numbers<[1], [0], [0], [1], [0, 0, 1, 1], [], []>} : vector<8x32xbf16>, vector<32x128xbf16>, vector<8x128xf32> -> vector<8x128xf32>
    %210 = arith.addf %207, %209 : vector<8x128xf32>
    %211 = vector.extract_strided_slice %210 {offsets = [0, 0], sizes = [8, 32], strides = [1, 1]} : vector<8x128xf32> to vector<8x32xf32>
    %212 = arith.negf %211 : vector<8x32xf32>
    %213 = math.exp %212 : vector<8x32xf32>
    %cst_96 = arith.constant 1.000000e+00 : f32
    %214 = vector.broadcast %cst_96 : f32 to vector<8x32xf32>
    %215 = arith.addf %214, %213 : vector<8x32xf32>
    %216 = arith.divf %214, %215 : vector<8x32xf32>
    %217 = vector.extract_strided_slice %210 {offsets = [0, 32], sizes = [8, 32], strides = [1, 1]} : vector<8x128xf32> to vector<8x32xf32>
    %218 = arith.negf %217 : vector<8x32xf32>
    %219 = math.exp %218 : vector<8x32xf32>
    %cst_97 = arith.constant 1.000000e+00 : f32
    %220 = vector.broadcast %cst_97 : f32 to vector<8x32xf32>
    %221 = arith.addf %220, %219 : vector<8x32xf32>
    %222 = arith.divf %220, %221 : vector<8x32xf32>
    %223 = vector.extract_strided_slice %210 {offsets = [0, 64], sizes = [8, 32], strides = [1, 1]} : vector<8x128xf32> to vector<8x32xf32>
    %224 = math.tanh %223 : vector<8x32xf32>
    %225 = vector.extract_strided_slice %210 {offsets = [0, 96], sizes = [8, 32], strides = [1, 1]} : vector<8x128xf32> to vector<8x32xf32>
    %226 = arith.negf %225 : vector<8x32xf32>
    %227 = math.exp %226 : vector<8x32xf32>
    %cst_98 = arith.constant 1.000000e+00 : f32
    %228 = vector.broadcast %cst_98 : f32 to vector<8x32xf32>
    %229 = arith.addf %228, %227 : vector<8x32xf32>
    %230 = arith.divf %228, %229 : vector<8x32xf32>
    %231 = arith.mulf %222, %205 : vector<8x32xf32>
    %232 = arith.mulf %216, %224 : vector<8x32xf32>
    %233 = arith.addf %231, %232 : vector<8x32xf32>
    %234 = math.tanh %233 : vector<8x32xf32>
    %235 = arith.mulf %230, %234 : vector<8x32xf32>
    %c0_99 = arith.constant 0 : index
    %c0_100 = arith.constant 0 : index
    %236 = vector.load %arg7[%c0_99, %c0_100] : memref<8x32xf32, #tpu.memory_space<vmem>>, vector<8x32xf32>
    tpu.vector_store %arg7[%c0_99, %c0_100], %233 {strides = array<i32>} : memref<8x32xf32, #tpu.memory_space<vmem>>, vector<8x32xf32>,
    %c0_101 = arith.constant 0 : index
    %c0_102 = arith.constant 0 : index
    %237 = vector.load %arg6[%c0_101, %c0_102] : memref<8x32xf32, #tpu.memory_space<vmem>>, vector<8x32xf32>
    tpu.vector_store %arg6[%c0_101, %c0_102], %235 {strides = array<i32>} : memref<8x32xf32, #tpu.memory_space<vmem>>, vector<8x32xf32>,
    %238 = arith.index_cast %203 : i32 to index
    %c0_103 = arith.constant 0 : index
    %239 = vector.load %arg4[%238, %c0_103] : memref<64x32xf32, #tpu.memory_space<vmem>>, vector<8x32xf32>
    tpu.vector_store %arg4[%238, %c0_103], %235 {strides = array<i32>} : memref<64x32xf32, #tpu.memory_space<vmem>>, vector<8x32xf32>,
    %c6_i32 = arith.constant 6 : i32
    %c8_i32_104 = arith.constant 8 : i32
    %240 = arith.muli %c6_i32, %c8_i32_104 : i32
    %241 = tpu.assume_multiple %240, 8 : i32
    %c0_105 = arith.constant 0 : index
    %c0_106 = arith.constant 0 : index
    %242 = vector.load %arg6[%c0_105, %c0_106] : memref<8x32xf32, #tpu.memory_space<vmem>>, vector<8x32xf32>
    %c0_107 = arith.constant 0 : index
    %c0_108 = arith.constant 0 : index
    %243 = vector.load %arg7[%c0_107, %c0_108] : memref<8x32xf32, #tpu.memory_space<vmem>>, vector<8x32xf32>
    %244 = arith.index_cast %241 : i32 to index
    %c0_109 = arith.constant 0 : index
    %245 = vector.load %arg5[%244, %c0_109] : memref<64x128xf32, #tpu.memory_space<vmem>>, vector<8x128xf32>
    %246 = arith.truncf %242 : vector<8x32xf32> to vector<8x32xbf16>
    %cst_110 = arith.constant dense<0.000000e+00> : vector<8x128xf32>
    %247 = tpu.matmul %246, %7, %cst_110 {dimension_numbers = #tpu.dot_dimension_numbers<[1], [0], [0], [1], [0, 0, 1, 1], [], []>} : vector<8x32xbf16>, vector<32x128xbf16>, vector<8x128xf32> -> vector<8x128xf32>
    %248 = arith.addf %245, %247 : vector<8x128xf32>
    %249 = vector.extract_strided_slice %248 {offsets = [0, 0], sizes = [8, 32], strides = [1, 1]} : vector<8x128xf32> to vector<8x32xf32>
    %250 = arith.negf %249 : vector<8x32xf32>
    %251 = math.exp %250 : vector<8x32xf32>
    %cst_111 = arith.constant 1.000000e+00 : f32
    %252 = vector.broadcast %cst_111 : f32 to vector<8x32xf32>
    %253 = arith.addf %252, %251 : vector<8x32xf32>
    %254 = arith.divf %252, %253 : vector<8x32xf32>
    %255 = vector.extract_strided_slice %248 {offsets = [0, 32], sizes = [8, 32], strides = [1, 1]} : vector<8x128xf32> to vector<8x32xf32>
    %256 = arith.negf %255 : vector<8x32xf32>
    %257 = math.exp %256 : vector<8x32xf32>
    %cst_112 = arith.constant 1.000000e+00 : f32
    %258 = vector.broadcast %cst_112 : f32 to vector<8x32xf32>
    %259 = arith.addf %258, %257 : vector<8x32xf32>
    %260 = arith.divf %258, %259 : vector<8x32xf32>
    %261 = vector.extract_strided_slice %248 {offsets = [0, 64], sizes = [8, 32], strides = [1, 1]} : vector<8x128xf32> to vector<8x32xf32>
    %262 = math.tanh %261 : vector<8x32xf32>
    %263 = vector.extract_strided_slice %248 {offsets = [0, 96], sizes = [8, 32], strides = [1, 1]} : vector<8x128xf32> to vector<8x32xf32>
    %264 = arith.negf %263 : vector<8x32xf32>
    %265 = math.exp %264 : vector<8x32xf32>
    %cst_113 = arith.constant 1.000000e+00 : f32
    %266 = vector.broadcast %cst_113 : f32 to vector<8x32xf32>
    %267 = arith.addf %266, %265 : vector<8x32xf32>
    %268 = arith.divf %266, %267 : vector<8x32xf32>
    %269 = arith.mulf %260, %243 : vector<8x32xf32>
    %270 = arith.mulf %254, %262 : vector<8x32xf32>
    %271 = arith.addf %269, %270 : vector<8x32xf32>
    %272 = math.tanh %271 : vector<8x32xf32>
    %273 = arith.mulf %268, %272 : vector<8x32xf32>
    %c0_114 = arith.constant 0 : index
    %c0_115 = arith.constant 0 : index
    %274 = vector.load %arg7[%c0_114, %c0_115] : memref<8x32xf32, #tpu.memory_space<vmem>>, vector<8x32xf32>
    tpu.vector_store %arg7[%c0_114, %c0_115], %271 {strides = array<i32>} : memref<8x32xf32, #tpu.memory_space<vmem>>, vector<8x32xf32>,
    %c0_116 = arith.constant 0 : index
    %c0_117 = arith.constant 0 : index
    %275 = vector.load %arg6[%c0_116, %c0_117] : memref<8x32xf32, #tpu.memory_space<vmem>>, vector<8x32xf32>
    tpu.vector_store %arg6[%c0_116, %c0_117], %273 {strides = array<i32>} : memref<8x32xf32, #tpu.memory_space<vmem>>, vector<8x32xf32>,
    %276 = arith.index_cast %241 : i32 to index
    %c0_118 = arith.constant 0 : index
    %277 = vector.load %arg4[%276, %c0_118] : memref<64x32xf32, #tpu.memory_space<vmem>>, vector<8x32xf32>
    tpu.vector_store %arg4[%276, %c0_118], %273 {strides = array<i32>} : memref<64x32xf32, #tpu.memory_space<vmem>>, vector<8x32xf32>,
    %c7_i32 = arith.constant 7 : i32
    %c8_i32_119 = arith.constant 8 : i32
    %278 = arith.muli %c7_i32, %c8_i32_119 : i32
    %279 = tpu.assume_multiple %278, 8 : i32
    %c0_120 = arith.constant 0 : index
    %c0_121 = arith.constant 0 : index
    %280 = vector.load %arg6[%c0_120, %c0_121] : memref<8x32xf32, #tpu.memory_space<vmem>>, vector<8x32xf32>
    %c0_122 = arith.constant 0 : index
    %c0_123 = arith.constant 0 : index
    %281 = vector.load %arg7[%c0_122, %c0_123] : memref<8x32xf32, #tpu.memory_space<vmem>>, vector<8x32xf32>
    %282 = arith.index_cast %279 : i32 to index
    %c0_124 = arith.constant 0 : index
    %283 = vector.load %arg5[%282, %c0_124] : memref<64x128xf32, #tpu.memory_space<vmem>>, vector<8x128xf32>
    %284 = arith.truncf %280 : vector<8x32xf32> to vector<8x32xbf16>
    %cst_125 = arith.constant dense<0.000000e+00> : vector<8x128xf32>
    %285 = tpu.matmul %284, %7, %cst_125 {dimension_numbers = #tpu.dot_dimension_numbers<[1], [0], [0], [1], [0, 0, 1, 1], [], []>} : vector<8x32xbf16>, vector<32x128xbf16>, vector<8x128xf32> -> vector<8x128xf32>
    %286 = arith.addf %283, %285 : vector<8x128xf32>
    %287 = vector.extract_strided_slice %286 {offsets = [0, 0], sizes = [8, 32], strides = [1, 1]} : vector<8x128xf32> to vector<8x32xf32>
    %288 = arith.negf %287 : vector<8x32xf32>
    %289 = math.exp %288 : vector<8x32xf32>
    %cst_126 = arith.constant 1.000000e+00 : f32
    %290 = vector.broadcast %cst_126 : f32 to vector<8x32xf32>
    %291 = arith.addf %290, %289 : vector<8x32xf32>
    %292 = arith.divf %290, %291 : vector<8x32xf32>
    %293 = vector.extract_strided_slice %286 {offsets = [0, 32], sizes = [8, 32], strides = [1, 1]} : vector<8x128xf32> to vector<8x32xf32>
    %294 = arith.negf %293 : vector<8x32xf32>
    %295 = math.exp %294 : vector<8x32xf32>
    %cst_127 = arith.constant 1.000000e+00 : f32
    %296 = vector.broadcast %cst_127 : f32 to vector<8x32xf32>
    %297 = arith.addf %296, %295 : vector<8x32xf32>
    %298 = arith.divf %296, %297 : vector<8x32xf32>
    %299 = vector.extract_strided_slice %286 {offsets = [0, 64], sizes = [8, 32], strides = [1, 1]} : vector<8x128xf32> to vector<8x32xf32>
    %300 = math.tanh %299 : vector<8x32xf32>
    %301 = vector.extract_strided_slice %286 {offsets = [0, 96], sizes = [8, 32], strides = [1, 1]} : vector<8x128xf32> to vector<8x32xf32>
    %302 = arith.negf %301 : vector<8x32xf32>
    %303 = math.exp %302 : vector<8x32xf32>
    %cst_128 = arith.constant 1.000000e+00 : f32
    %304 = vector.broadcast %cst_128 : f32 to vector<8x32xf32>
    %305 = arith.addf %304, %303 : vector<8x32xf32>
    %306 = arith.divf %304, %305 : vector<8x32xf32>
    %307 = arith.mulf %298, %281 : vector<8x32xf32>
    %308 = arith.mulf %292, %300 : vector<8x32xf32>
    %309 = arith.addf %307, %308 : vector<8x32xf32>
    %310 = math.tanh %309 : vector<8x32xf32>
    %311 = arith.mulf %306, %310 : vector<8x32xf32>
    %c0_129 = arith.constant 0 : index
    %c0_130 = arith.constant 0 : index
    %312 = vector.load %arg7[%c0_129, %c0_130] : memref<8x32xf32, #tpu.memory_space<vmem>>, vector<8x32xf32>
    tpu.vector_store %arg7[%c0_129, %c0_130], %309 {strides = array<i32>} : memref<8x32xf32, #tpu.memory_space<vmem>>, vector<8x32xf32>,
    %c0_131 = arith.constant 0 : index
    %c0_132 = arith.constant 0 : index
    %313 = vector.load %arg6[%c0_131, %c0_132] : memref<8x32xf32, #tpu.memory_space<vmem>>, vector<8x32xf32>
    tpu.vector_store %arg6[%c0_131, %c0_132], %311 {strides = array<i32>} : memref<8x32xf32, #tpu.memory_space<vmem>>, vector<8x32xf32>,
    %314 = arith.index_cast %279 : i32 to index
    %c0_133 = arith.constant 0 : index
    %315 = vector.load %arg4[%314, %c0_133] : memref<64x32xf32, #tpu.memory_space<vmem>>, vector<8x32xf32>
    tpu.vector_store %arg4[%314, %c0_133], %311 {strides = array<i32>} : memref<64x32xf32, #tpu.memory_space<vmem>>, vector<8x32xf32>,
    %c8_i32_134 = arith.constant 8 : i32
    return
  }
}

</mosaic_0001>

<bundles_post_ra>
// kernel: lstm_decoder_forward.1
= control target key start
LH: loop header
LB: loop body
LE: loop exit
PB: predicated region body
PF: predicated region fallthrough
CT: control target
= control target key end

     0   :  { %vm64_vm0 = vcmask 1041408   ;;  %vm109_vm1 = vcmask 261120   ;;  %v852_v2 = vmov 0.0   ;;  %vm51_vm2 = vcmask 31744   ;;  %s853_s23 = smov 64   ;;  %s854_s24 = smov 32   ;;  %s1045_s1 = inlined_call_operand.vmem [shape: bf16[4,128], index: 1, kind: input, shape index: {}]   ;;  %s1046_s2 = inlined_call_operand.vmem [shape: bf16[32,128], index: 2, kind: input, shape index: {}]   ;;  %s1047_s0 = inlined_call_operand.vmem [shape: bf16[64,4], index: 0, kind: input, shape index: {}]   ;;  %s1048_s3 = inlined_call_operand.vmem [shape: f32[1,128], index: 3, kind: input, shape index: {}]   ;;  %s1049_s4 = inlined_call_operand.vmem [shape: f32[64,32], index: 4, kind: output, shape index: {}]  }
   0x1   :  { %v26_v0 = vld [vmem:[%s1045_s1] sm:$0x3]  ;;  %v887_v1 = vld [vmem:[%s1046_s2 + $0x8] sm:$0xff]  ;;  %110 = vst.msk [vmem:[#allocation3] sm:$0xff] %vm109_vm1, %v852_v2 }
   0x2   :  { %v66_v3 = vsel %vm64_vm0, %v26_v0, 0  ;;  %v777_v4 = vld [vmem:[%s1047_s0] sm:$0xff]  ;;  %111 = vst.msk [vmem:[#allocation4] sm:$0xff] %vm109_vm1, %v852_v2  ;;  %137 = vmatpush.bf16.msra.mxu1 %v887_v1  ;;  %211 = vmatpush.bf16.msra.mxu2 %v887_v1 }
   0x3   :  { %75 = vmatpush.bf16.msra.mxu0 %v66_v3  ;;  %v898_v5 = vld [vmem:[%s1046_s2] sm:$0xff]  ;;  %286 = vmatpush.bf16.msra.mxu3 %v887_v1 }
   0x4   :  { %v918_v8 = vld [vmem:[%s1048_s3] ss:$0 sm:$0xff]  ;;  %s855_s3 = smov 96  }
   0x6   :  { %742 = vmatmul.msk.bf16.vlgmr.msra.gmra.mxu0 %vm51_vm2, %v777_v4  ;;  %138 = vmatpush.bf16.msra.mxu1 %v898_v5 }
   0x7   :  { %212 = vmatpush.bf16.msra.mxu2 %v898_v5  ;;  %287 = vmatpush.bf16.msra.mxu3 %v898_v5 }
   0x8   :  { %v112_v6 = vld [vmem:[#allocation3] sm:$0xff] }
   0x9   :  { %v115_v7 = vpack.c.bf16 %v112_v6, %v112_v6  ;;  %v113_v15 = vld [vmem:[#allocation4] sm:$0xff] }
   0xa   :  { %361 = vmatpush.bf16.msrb.mxu1 %v887_v1 }
   0xb   :  { %436 = vmatpush.bf16.msrb.mxu2 %v887_v1  ;;  %511 = vmatpush.bf16.msrb.mxu3 %v887_v1 }
   0xc   :  { %754 = vmatmul.msk.bf16.vlgmr.msra.gmra.mxu1 %vm109_vm1, %v115_v7 }
   0xe   :  { %362 = vmatpush.bf16.msrb.mxu1 %v898_v5 }
   0xf   :  { %437 = vmatpush.bf16.msrb.mxu2 %v898_v5  ;;  %512 = vmatpush.bf16.msrb.mxu3 %v898_v5 }
  0x12   :  { %586 = vmatpush.bf16.msra.mxu1 %v887_v1 }
  0x16   :  { %587 = vmatpush.bf16.msra.mxu1 %v898_v5 }
  0x83   :  { %v77_v9 = vpop.f32.mrf.mxu0 }
  0x84   :  { %v78_v10 = vadd.f32 %v918_v8, %v77_v9 }
  0x89   :  { %v140_v11 = vpop.f32.mrf.mxu1 }
  0x8a   :  { %v144_v12 = vadd.f32 %v140_v11, %v78_v10  ;;  %v778_v10 = vld [vmem:[%s1047_s0 + $0x8] sm:$0xff] }
  0x8b   :  { %v79_v43 = vpop.f32.mrf.mxu0  ;;  %743 = vmatmul.msk.bf16.gmra.mxu0 %vm51_vm2, %v778_v10 }
  0x8c   :  { %788 = vtanh.f32 %v144_v12  ;;  %v755_v16 = vmul.f32 -1.442695, %v144_v12  ;;  %v80_v44 = vadd.f32 %v918_v8, %v79_v43 }
  0x8e   :  { %790 = vpow2.f32 %v755_v16 }
  0x91   :  { %v142_v13 = vpop.f32.mrf.mxu1 }
  0x92   :  { %v789_v14 = vpop.eup %788 }
  0x93   :  { %171 = vrot.lane.b32.xlu0 %v789_v14, %s853_s23 }
  0x94   :  { %v791_v17 = vpop.eup %790 }
  0x95   :  { %v148_v18 = vadd.f32 1.0, %v791_v17 }
  0x97   :  { %792 = vrcp.f32 %v148_v18  ;;  %v160_v24 = vand.u32 2147483648, %v148_v18  ;;  %vm154_vm4 = vweird.f32 %v148_v18  ;;  %v158_v25 = vand.u32 2147483647, %v148_v18 }
  0x99   :  { %v161_v27 = vor.u32 1.1754944e-38, %v160_v24  ;;  %vm159_vm6 = vcmp.eq.f32.partialorder %v158_v25, 8.507059e+37 }
  0x9b   :  { %166 = vrot.lane.b32.xlu0 %v113_v15, %s854_s24 }
  0x9d   :  { %v793_v19 = vpop.eup %792 }
  0x9e   :  { %v150_v20 = vmul.f32 %v793_v19, %v148_v18  ;;  %vm155_vm3 = vweird.f32 %v793_v19 }
  0x9f   :  { %vm156_vm5 = vmor %vm154_vm4, %vm155_vm3 }
  0xa0   :  { %v151_v21 = vsub.f32 1.0, %v150_v20 }
  0xa2   :  { %v152_v22 = vmul.f32 %v793_v19, %v151_v21 }
  0xa4   :  { %v153_v23 = vadd.f32 %v793_v19, %v152_v22 }
  0xa6   :  { %v157_v26 = vsel %vm156_vm5, %v793_v19, %v153_v23 }
  0xa7   :  { %v162_v29 = vsel %vm159_vm6, %v161_v27, %v157_v26 }
 0x105   :  { %v172_v28 = vpop.permute.xlu0 %171 }
 0x106   :  { %v174_v30 = vmul.f32 %v172_v28, %v162_v29 }
 0x108   :  { %176 = vrot.lane.b32.xlu1 %v174_v30, %s854_s24  ;;  %v82_v14 = vpop.f32.mrf.mxu0 }
 0x109   :  { %v83_v15 = vadd.f32 %v918_v8, %v82_v14  ;;  %v779_v14 = vld [vmem:[%s1047_s0 + $0x10] sm:$0xff] }
 0x10a   :  { %744 = vmatmul.msk.bf16.gmra.mxu0 %vm51_vm2, %v779_v14 }
 0x10d   :  { %v167_v31 = vpop.permute.xlu0 %166 }
 0x10e   :  { %v169_v32 = vmul.f32 %v167_v31, %v162_v29 }
 0x17a   :  { %v177_v33 = vpop.permute.xlu1 %176 }
 0x17b   :  { %v179_v34 = vadd.f32 %v177_v33, %v169_v32 }
 0x17d   :  { %794 = vtanh.f32 %v179_v34 }
 0x183   :  { %v795_v35 = vpop.eup %794 }
 0x184   :  { %182 = vrot.lane.b32.xlu1 %v795_v35, %s853_s23 }
 0x1f6   :  { %v183_v36 = vpop.permute.xlu1 %182 }
 0x1f7   :  { %v185_v37 = vmul.f32 %v183_v36, %v162_v29 }
 0x1f9   :  { %192 = vrot.lane.b32.xlu2 %v185_v37, %s854_s24 }
 0x201   :  { %187 = vrot.lane.b32.xlu2 %v179_v34, %s855_s3 }
 0x253   :  { %v193_v38 = vpop.permute.xlu2 %192 }
 0x254   :  { %195 = vst.msk [vmem:[#allocation3] sm:$0xff] %vm109_vm1, %v193_v38 }
 0x255   :  { %196 = vst.msk [vmem:[%s1049_s4] sm:$0xff] %vm109_vm1, %v193_v38 }
 0x25b   :  { %v188_v39 = vpop.permute.xlu2 %187  ;;  %v197_v40 = vld [vmem:[#allocation3] sm:$0xff] }
 0x25c   :  { %190 = vst.msk [vmem:[#allocation4] sm:$0xff] %vm109_vm1, %v188_v39  ;;  %v201_v41 = vpack.c.bf16 %v197_v40, %v197_v40 }
 0x25e   :  { %756 = vmatmul.msk.bf16.vlgmr.msra.gmra.mxu2 %vm109_vm1, %v201_v41 }
 0x25f   :  { %661 = vmatpush.bf16.msra.mxu2 %v887_v1 }
 0x263   :  { %v198_v42 = vld [vmem:[#allocation4] sm:$0xff]  ;;  %662 = vmatpush.bf16.msra.mxu2 %v898_v5 }
 0x264   :  { %240 = vrot.lane.b32.xlu1 %v198_v42, %s854_s24 }
 0x2d6   :  { %v241_v0 = vpop.permute.xlu1 %240 }
 0x2e1   :  { %v214_v45 = vpop.f32.mrf.mxu2 }
 0x2e2   :  { %v218_v46 = vadd.f32 %v214_v45, %v80_v44 }
 0x2e4   :  { %796 = vtanh.f32 %v218_v46  ;;  %v757_v49 = vmul.f32 -1.442695, %v218_v46 }
 0x2e6   :  { %798 = vpow2.f32 %v757_v49 }
 0x2e9   :  { %v216_v47 = vpop.f32.mrf.mxu2 }
 0x2ea   :  { %v797_v48 = vpop.eup %796  ;;  %v84_v47 = vpop.f32.mrf.mxu0 }
 0x2eb   :  { %245 = vrot.lane.b32.xlu0 %v797_v48, %s853_s23  ;;  %v85_v48 = vadd.f32 %v918_v8, %v84_v47 }
 0x2ec   :  { %v799_v50 = vpop.eup %798 }
 0x2ed   :  { %v222_v51 = vadd.f32 1.0, %v799_v50 }
 0x2ef   :  { %800 = vrcp.f32 %v222_v51  ;;  %v234_v57 = vand.u32 2147483648, %v222_v51  ;;  %vm228_vm8 = vweird.f32 %v222_v51  ;;  %v232_v58 = vand.u32 2147483647, %v222_v51 }
 0x2f1   :  { %v235_v60 = vor.u32 1.1754944e-38, %v234_v57  ;;  %vm233_vm10 = vcmp.eq.f32.partialorder %v232_v58, 8.507059e+37 }
 0x2f5   :  { %v801_v52 = vpop.eup %800 }
 0x2f6   :  { %v224_v53 = vmul.f32 %v801_v52, %v222_v51  ;;  %vm229_vm7 = vweird.f32 %v801_v52 }
 0x2f7   :  { %vm230_vm9 = vmor %vm228_vm8, %vm229_vm7 }
 0x2f8   :  { %v225_v54 = vsub.f32 1.0, %v224_v53 }
 0x2fa   :  { %v226_v55 = vmul.f32 %v801_v52, %v225_v54 }
 0x2fc   :  { %v227_v56 = vadd.f32 %v801_v52, %v226_v55 }
 0x2fe   :  { %v231_v59 = vsel %vm230_vm9, %v801_v52, %v227_v56 }
 0x2ff   :  { %v236_v62 = vsel %vm233_vm10, %v235_v60, %v231_v59 }
 0x300   :  { %v243_v1 = vmul.f32 %v241_v0, %v236_v62 }
 0x35d   :  { %v246_v61 = vpop.permute.xlu0 %245 }
 0x35e   :  { %v248_v63 = vmul.f32 %v246_v61, %v236_v62 }
 0x360   :  { %250 = vrot.lane.b32.xlu2 %v248_v63, %s854_s24 }
 0x3ba   :  { %v251_v2 = vpop.permute.xlu2 %250 }
 0x3bb   :  { %v253_v3 = vadd.f32 %v251_v2, %v243_v1 }
 0x3bd   :  { %802 = vtanh.f32 %v253_v3  ;;  %261 = vrot.lane.b32.xlu2 %v253_v3, %s855_s3 }
 0x3c3   :  { %v803_v4 = vpop.eup %802 }
 0x3c4   :  { %256 = vrot.lane.b32.xlu0 %v803_v4, %s853_s23 }
 0x417   :  { %v262_v5 = vpop.permute.xlu2 %261 }
 0x418   :  { %264 = vst.msk [vmem:[#allocation4] sm:$0xff] %vm109_vm1, %v262_v5 }
 0x41f   :  { %v273_v9 = vld [vmem:[#allocation4] sm:$0xff] }
 0x436   :  { %v257_v6 = vpop.permute.xlu0 %256 }
 0x437   :  { %v259_v7 = vmul.f32 %v257_v6, %v236_v62 }
 0x439   :  { %266 = vrot.lane.b32.xlu1 %v259_v7, %s854_s24 }
 0x441   :  { %315 = vrot.lane.b32.xlu1 %v273_v9, %s854_s24 }
 0x4ab   :  { %v267_v11 = vpop.permute.xlu1 %266 }
 0x4ac   :  { %269 = vst.msk [vmem:[#allocation3] sm:$0xff] %vm109_vm1, %v267_v11 }
 0x4ad   :  { %758 = vst.msk [vmem:[%s1049_s4 + $0x8] sm:$0xff] %vm109_vm1, %v267_v11 }
 0x4b3   :  { %v272_v12 = vld [vmem:[#allocation3] sm:$0xff]  ;;  %v316_v35 = vpop.permute.xlu1 %315 }
 0x4b4   :  { %v276_v13 = vpack.c.bf16 %v272_v12, %v272_v12 }
 0x4b6   :  { %759 = vmatmul.msk.bf16.vlgmr.msra.gmra.mxu3 %vm109_vm1, %v276_v13 }
 0x539   :  { %v289_v16 = vpop.f32.mrf.mxu3 }
 0x53a   :  { %v293_v17 = vadd.f32 %v289_v16, %v83_v15 }
 0x53c   :  { %804 = vtanh.f32 %v293_v17  ;;  %v760_v20 = vmul.f32 -1.442695, %v293_v17 }
 0x53e   :  { %806 = vpow2.f32 %v760_v20 }
 0x541   :  { %v291_v18 = vpop.f32.mrf.mxu3 }
 0x542   :  { %v805_v19 = vpop.eup %804  ;;  %v87_v18 = vpop.f32.mrf.mxu0 }
 0x543   :  { %320 = vrot.lane.b32.xlu0 %v805_v19, %s853_s23  ;;  %v88_v19 = vadd.f32 %v918_v8, %v87_v18  ;;  %v780_v18 = vld [vmem:[%s1047_s0 + $0x18] sm:$0xff] }
 0x544   :  { %v807_v21 = vpop.eup %806  ;;  %745 = vmatmul.msk.bf16.gmra.mxu0 %vm51_vm2, %v780_v18 }
 0x545   :  { %v297_v22 = vadd.f32 1.0, %v807_v21 }
 0x547   :  { %808 = vrcp.f32 %v297_v22  ;;  %v309_v28 = vand.u32 2147483648, %v297_v22  ;;  %vm303_vm12 = vweird.f32 %v297_v22  ;;  %v307_v29 = vand.u32 2147483647, %v297_v22 }
 0x549   :  { %v310_v31 = vor.u32 1.1754944e-38, %v309_v28  ;;  %vm308_vm14 = vcmp.eq.f32.partialorder %v307_v29, 8.507059e+37 }
 0x54d   :  { %v809_v23 = vpop.eup %808 }
 0x54e   :  { %v299_v24 = vmul.f32 %v809_v23, %v297_v22  ;;  %vm304_vm11 = vweird.f32 %v809_v23 }
 0x54f   :  { %vm305_vm13 = vmor %vm303_vm12, %vm304_vm11 }
 0x550   :  { %v300_v25 = vsub.f32 1.0, %v299_v24 }
 0x552   :  { %v301_v26 = vmul.f32 %v809_v23, %v300_v25 }
 0x554   :  { %v302_v27 = vadd.f32 %v809_v23, %v301_v26 }
 0x556   :  { %v306_v30 = vsel %vm305_vm13, %v809_v23, %v302_v27 }
 0x557   :  { %v311_v33 = vsel %vm308_vm14, %v310_v31, %v306_v30 }
 0x558   :  { %v318_v36 = vmul.f32 %v316_v35, %v311_v33 }
 0x5b5   :  { %v321_v32 = vpop.permute.xlu0 %320 }
 0x5b6   :  { %v323_v34 = vmul.f32 %v321_v32, %v311_v33 }
 0x5b8   :  { %325 = vrot.lane.b32.xlu2 %v323_v34, %s854_s24 }
 0x612   :  { %v326_v37 = vpop.permute.xlu2 %325 }
 0x613   :  { %v328_v38 = vadd.f32 %v326_v37, %v318_v36 }
 0x615   :  { %810 = vtanh.f32 %v328_v38  ;;  %336 = vrot.lane.b32.xlu2 %v328_v38, %s855_s3 }
 0x61b   :  { %v811_v39 = vpop.eup %810 }
 0x61c   :  { %331 = vrot.lane.b32.xlu0 %v811_v39, %s853_s23 }
 0x66f   :  { %v337_v40 = vpop.permute.xlu2 %336 }
 0x670   :  { %339 = vst.msk [vmem:[#allocation4] sm:$0xff] %vm109_vm1, %v337_v40 }
 0x677   :  { %v348_v43 = vld [vmem:[#allocation4] sm:$0xff] }
 0x68e   :  { %v332_v41 = vpop.permute.xlu0 %331 }
 0x68f   :  { %v334_v42 = vmul.f32 %v332_v41, %v311_v33 }
 0x691   :  { %341 = vrot.lane.b32.xlu1 %v334_v42, %s854_s24 }
 0x699   :  { %390 = vrot.lane.b32.xlu1 %v348_v43, %s854_s24 }
 0x703   :  { %v342_v44 = vpop.permute.xlu1 %341 }
 0x704   :  { %344 = vst.msk [vmem:[#allocation3] sm:$0xff] %vm109_vm1, %v342_v44 }
 0x705   :  { %761 = vst.msk [vmem:[%s1049_s4 + $0x10] sm:$0xff] %vm109_vm1, %v342_v44 }
 0x70b   :  { %v347_v45 = vld [vmem:[#allocation3] sm:$0xff]  ;;  %v391_v4 = vpop.permute.xlu1 %390 }
 0x70c   :  { %v351_v46 = vpack.c.bf16 %v347_v45, %v347_v45 }
 0x70e   :  { %762 = vmatmul.msk.bf16.vlgmr.msrb.gmra.mxu1 %vm109_vm1, %v351_v46 }
 0x78b   :  { %v364_v49 = vpop.f32.mrf.mxu1 }
 0x78c   :  { %v368_v50 = vadd.f32 %v364_v49, %v85_v48 }
 0x78e   :  { %812 = vtanh.f32 %v368_v50  ;;  %v763_v53 = vmul.f32 -1.442695, %v368_v50 }
 0x790   :  { %814 = vpow2.f32 %v763_v53 }
 0x793   :  { %v366_v51 = vpop.f32.mrf.mxu1 }
 0x794   :  { %v813_v52 = vpop.eup %812  ;;  %v89_v51 = vpop.f32.mrf.mxu0 }
 0x795   :  { %395 = vrot.lane.b32.xlu0 %v813_v52, %s853_s23  ;;  %v90_v52 = vadd.f32 %v918_v8, %v89_v51 }
 0x796   :  { %v815_v54 = vpop.eup %814 }
 0x797   :  { %v372_v55 = vadd.f32 1.0, %v815_v54 }
 0x799   :  { %816 = vrcp.f32 %v372_v55  ;;  %v384_v61 = vand.u32 2147483648, %v372_v55  ;;  %vm378_vm0 = vweird.f32 %v372_v55  ;;  %v382_v62 = vand.u32 2147483647, %v372_v55 }
 0x79b   :  { %v385_v0 = vor.u32 1.1754944e-38, %v384_v61  ;;  %vm383_vm4 = vcmp.eq.f32.partialorder %v382_v62, 8.507059e+37 }
 0x79f   :  { %v817_v56 = vpop.eup %816 }
 0x7a0   :  { %v374_v57 = vmul.f32 %v817_v56, %v372_v55  ;;  %vm379_vm15 = vweird.f32 %v817_v56 }
 0x7a1   :  { %vm380_vm3 = vmor %vm378_vm0, %vm379_vm15 }
 0x7a2   :  { %v375_v58 = vsub.f32 1.0, %v374_v57 }
 0x7a4   :  { %v376_v59 = vmul.f32 %v817_v56, %v375_v58 }
 0x7a6   :  { %v377_v60 = vadd.f32 %v817_v56, %v376_v59 }
 0x7a8   :  { %v381_v63 = vsel %vm380_vm3, %v817_v56, %v377_v60 }
 0x7a9   :  { %v386_v2 = vsel %vm383_vm4, %v385_v0, %v381_v63 }
 0x7aa   :  { %v393_v5 = vmul.f32 %v391_v4, %v386_v2 }
 0x807   :  { %v396_v1 = vpop.permute.xlu0 %395 }
 0x808   :  { %v398_v3 = vmul.f32 %v396_v1, %v386_v2 }
 0x80a   :  { %400 = vrot.lane.b32.xlu2 %v398_v3, %s854_s24 }
 0x864   :  { %v401_v6 = vpop.permute.xlu2 %400 }
 0x865   :  { %v403_v7 = vadd.f32 %v401_v6, %v393_v5 }
 0x867   :  { %818 = vtanh.f32 %v403_v7  ;;  %411 = vrot.lane.b32.xlu2 %v403_v7, %s855_s3 }
 0x86d   :  { %v819_v9 = vpop.eup %818 }
 0x86e   :  { %406 = vrot.lane.b32.xlu0 %v819_v9, %s853_s23 }
 0x8c1   :  { %v412_v10 = vpop.permute.xlu2 %411 }
 0x8c2   :  { %414 = vst.msk [vmem:[#allocation4] sm:$0xff] %vm109_vm1, %v412_v10 }
 0x8c9   :  { %v423_v13 = vld [vmem:[#allocation4] sm:$0xff] }
 0x8e0   :  { %v407_v11 = vpop.permute.xlu0 %406 }
 0x8e1   :  { %v409_v12 = vmul.f32 %v407_v11, %v386_v2 }
 0x8e3   :  { %416 = vrot.lane.b32.xlu1 %v409_v12, %s854_s24 }
 0x8eb   :  { %465 = vrot.lane.b32.xlu1 %v423_v13, %s854_s24 }
 0x955   :  { %v417_v15 = vpop.permute.xlu1 %416 }
 0x956   :  { %419 = vst.msk [vmem:[#allocation3] sm:$0xff] %vm109_vm1, %v417_v15 }
 0x957   :  { %764 = vst.msk [vmem:[%s1049_s4 + $0x18] sm:$0xff] %vm109_vm1, %v417_v15 }
 0x95d   :  { %v422_v16 = vld [vmem:[#allocation3] sm:$0xff]  ;;  %v466_v39 = vpop.permute.xlu1 %465 }
 0x95e   :  { %v426_v17 = vpack.c.bf16 %v422_v16, %v422_v16 }
 0x960   :  { %765 = vmatmul.msk.bf16.vlgmr.msrb.gmra.mxu2 %vm109_vm1, %v426_v17 }
 0x9e3   :  { %v439_v20 = vpop.f32.mrf.mxu2 }
 0x9e4   :  { %v443_v21 = vadd.f32 %v439_v20, %v88_v19 }
 0x9e6   :  { %820 = vtanh.f32 %v443_v21  ;;  %v766_v24 = vmul.f32 -1.442695, %v443_v21 }
 0x9e8   :  { %822 = vpow2.f32 %v766_v24 }
 0x9eb   :  { %v441_v22 = vpop.f32.mrf.mxu2 }
 0x9ec   :  { %v821_v23 = vpop.eup %820  ;;  %v92_v22 = vpop.f32.mrf.mxu0 }
 0x9ed   :  { %470 = vrot.lane.b32.xlu0 %v821_v23, %s853_s23  ;;  %v93_v23 = vadd.f32 %v918_v8, %v92_v22 }
 0x9ee   :  { %v823_v25 = vpop.eup %822 }
 0x9ef   :  { %v447_v26 = vadd.f32 1.0, %v823_v25 }
 0x9f1   :  { %824 = vrcp.f32 %v447_v26  ;;  %v459_v32 = vand.u32 2147483648, %v447_v26  ;;  %vm453_vm6 = vweird.f32 %v447_v26  ;;  %v457_v33 = vand.u32 2147483647, %v447_v26 }
 0x9f3   :  { %v460_v35 = vor.u32 1.1754944e-38, %v459_v32  ;;  %vm458_vm8 = vcmp.eq.f32.partialorder %v457_v33, 8.507059e+37 }
 0x9f7   :  { %v825_v27 = vpop.eup %824 }
 0x9f8   :  { %v449_v28 = vmul.f32 %v825_v27, %v447_v26  ;;  %vm454_vm5 = vweird.f32 %v825_v27 }
 0x9f9   :  { %vm455_vm7 = vmor %vm453_vm6, %vm454_vm5 }
 0x9fa   :  { %v450_v29 = vsub.f32 1.0, %v449_v28 }
 0x9fc   :  { %v451_v30 = vmul.f32 %v825_v27, %v450_v29 }
 0x9fe   :  { %v452_v31 = vadd.f32 %v825_v27, %v451_v30 }
 0xa00   :  { %v456_v34 = vsel %vm455_vm7, %v825_v27, %v452_v31 }
 0xa01   :  { %v461_v37 = vsel %vm458_vm8, %v460_v35, %v456_v34 }
 0xa02   :  { %v468_v40 = vmul.f32 %v466_v39, %v461_v37 }
 0xa5f   :  { %v471_v36 = vpop.permute.xlu0 %470 }
 0xa60   :  { %v473_v38 = vmul.f32 %v471_v36, %v461_v37 }
 0xa62   :  { %475 = vrot.lane.b32.xlu2 %v473_v38, %s854_s24 }
 0xabc   :  { %v476_v41 = vpop.permute.xlu2 %475 }
 0xabd   :  { %v478_v42 = vadd.f32 %v476_v41, %v468_v40 }
 0xabf   :  { %826 = vtanh.f32 %v478_v42  ;;  %486 = vrot.lane.b32.xlu2 %v478_v42, %s855_s3 }
 0xac5   :  { %v827_v43 = vpop.eup %826 }
 0xac6   :  { %481 = vrot.lane.b32.xlu0 %v827_v43, %s853_s23 }
 0xb19   :  { %v487_v44 = vpop.permute.xlu2 %486 }
 0xb1a   :  { %489 = vst.msk [vmem:[#allocation4] sm:$0xff] %vm109_vm1, %v487_v44 }
 0xb21   :  { %v498_v47 = vld [vmem:[#allocation4] sm:$0xff] }
 0xb38   :  { %v482_v45 = vpop.permute.xlu0 %481 }
 0xb39   :  { %v484_v46 = vmul.f32 %v482_v45, %v461_v37 }
 0xb3b   :  { %491 = vrot.lane.b32.xlu1 %v484_v46, %s854_s24 }
 0xb43   :  { %540 = vrot.lane.b32.xlu1 %v498_v47, %s854_s24 }
 0xbad   :  { %v492_v48 = vpop.permute.xlu1 %491 }
 0xbae   :  { %494 = vst.msk [vmem:[#allocation3] sm:$0xff] %vm109_vm1, %v492_v48 }
 0xbaf   :  { %767 = vst.msk [vmem:[%s1049_s4 + $0x20] sm:$0xff] %vm109_vm1, %v492_v48 }
 0xbb5   :  { %v497_v49 = vld [vmem:[#allocation3] sm:$0xff]  ;;  %v541_v9 = vpop.permute.xlu1 %540 }
 0xbb6   :  { %v501_v50 = vpack.c.bf16 %v497_v49, %v497_v49 }
 0xbb8   :  { %768 = vmatmul.msk.bf16.vlgmr.msrb.gmra.mxu3 %vm109_vm1, %v501_v50 }
 0xc3b   :  { %v514_v53 = vpop.f32.mrf.mxu3 }
 0xc3c   :  { %v518_v54 = vadd.f32 %v514_v53, %v90_v52 }
 0xc3e   :  { %828 = vtanh.f32 %v518_v54  ;;  %v769_v57 = vmul.f32 -1.442695, %v518_v54 }
 0xc40   :  { %830 = vpow2.f32 %v769_v57 }
 0xc43   :  { %v516_v55 = vpop.f32.mrf.mxu3 }
 0xc44   :  { %v829_v56 = vpop.eup %828  ;;  %v94_v55 = vpop.f32.mrf.mxu0 }
 0xc45   :  { %545 = vrot.lane.b32.xlu0 %v829_v56, %s853_s23  ;;  %v95_v56 = vadd.f32 %v918_v8, %v94_v55 }
 0xc46   :  { %v831_v58 = vpop.eup %830 }
 0xc47   :  { %v522_v59 = vadd.f32 1.0, %v831_v58 }
 0xc49   :  { %832 = vrcp.f32 %v522_v59  ;;  %v534_v1 = vand.u32 2147483648, %v522_v59  ;;  %vm528_vm10 = vweird.f32 %v522_v59  ;;  %v532_v2 = vand.u32 2147483647, %v522_v59 }
 0xc4b   :  { %v535_v4 = vor.u32 1.1754944e-38, %v534_v1  ;;  %vm533_vm12 = vcmp.eq.f32.partialorder %v532_v2, 8.507059e+37 }
 0xc4f   :  { %v833_v60 = vpop.eup %832 }
 0xc50   :  { %v524_v61 = vmul.f32 %v833_v60, %v522_v59  ;;  %vm529_vm9 = vweird.f32 %v833_v60 }
 0xc51   :  { %vm530_vm11 = vmor %vm528_vm10, %vm529_vm9 }
 0xc52   :  { %v525_v62 = vsub.f32 1.0, %v524_v61 }
 0xc54   :  { %v526_v63 = vmul.f32 %v833_v60, %v525_v62 }
 0xc56   :  { %v527_v0 = vadd.f32 %v833_v60, %v526_v63 }
 0xc58   :  { %v531_v3 = vsel %vm530_vm11, %v833_v60, %v527_v0 }
 0xc59   :  { %v536_v6 = vsel %vm533_vm12, %v535_v4, %v531_v3 }
 0xc5a   :  { %v543_v10 = vmul.f32 %v541_v9, %v536_v6 }
 0xcb7   :  { %v546_v5 = vpop.permute.xlu0 %545 }
 0xcb8   :  { %v548_v7 = vmul.f32 %v546_v5, %v536_v6 }
 0xcba   :  { %550 = vrot.lane.b32.xlu2 %v548_v7, %s854_s24 }
 0xd14   :  { %v551_v11 = vpop.permute.xlu2 %550 }
 0xd15   :  { %v553_v12 = vadd.f32 %v551_v11, %v543_v10 }
 0xd17   :  { %834 = vtanh.f32 %v553_v12  ;;  %561 = vrot.lane.b32.xlu2 %v553_v12, %s855_s3 }
 0xd1d   :  { %v835_v13 = vpop.eup %834 }
 0xd1e   :  { %556 = vrot.lane.b32.xlu0 %v835_v13, %s853_s23 }
 0xd71   :  { %v562_v14 = vpop.permute.xlu2 %561 }
 0xd72   :  { %564 = vst.msk [vmem:[#allocation4] sm:$0xff] %vm109_vm1, %v562_v14 }
 0xd79   :  { %v573_v17 = vld [vmem:[#allocation4] sm:$0xff] }
 0xd90   :  { %v557_v15 = vpop.permute.xlu0 %556 }
 0xd91   :  { %v559_v16 = vmul.f32 %v557_v15, %v536_v6 }
 0xd93   :  { %566 = vrot.lane.b32.xlu1 %v559_v16, %s854_s24 }
 0xd9b   :  { %615 = vrot.lane.b32.xlu1 %v573_v17, %s854_s24 }
 0xe05   :  { %v567_v19 = vpop.permute.xlu1 %566 }
 0xe06   :  { %569 = vst.msk [vmem:[#allocation3] sm:$0xff] %vm109_vm1, %v567_v19 }
 0xe07   :  { %770 = vst.msk [vmem:[%s1049_s4 + $0x28] sm:$0xff] %vm109_vm1, %v567_v19 }
 0xe0d   :  { %v572_v20 = vld [vmem:[#allocation3] sm:$0xff]  ;;  %v616_v43 = vpop.permute.xlu1 %615 }
 0xe0e   :  { %v576_v21 = vpack.c.bf16 %v572_v20, %v572_v20 }
 0xe10   :  { %771 = vmatmul.msk.bf16.vlgmr.msra.gmra.mxu1 %vm109_vm1, %v576_v21 }
 0xe8d   :  { %v589_v24 = vpop.f32.mrf.mxu1 }
 0xe8e   :  { %v593_v25 = vadd.f32 %v589_v24, %v93_v23 }
 0xe90   :  { %836 = vtanh.f32 %v593_v25  ;;  %v772_v28 = vmul.f32 -1.442695, %v593_v25 }
 0xe92   :  { %838 = vpow2.f32 %v772_v28 }
 0xe95   :  { %v591_v26 = vpop.f32.mrf.mxu1 }
 0xe96   :  { %v837_v27 = vpop.eup %836 }
 0xe97   :  { %620 = vrot.lane.b32.xlu0 %v837_v27, %s853_s23 }
 0xe98   :  { %v839_v29 = vpop.eup %838 }
 0xe99   :  { %v597_v30 = vadd.f32 1.0, %v839_v29 }
 0xe9b   :  { %840 = vrcp.f32 %v597_v30  ;;  %v609_v36 = vand.u32 2147483648, %v597_v30  ;;  %vm603_vm13 = vweird.f32 %v597_v30  ;;  %v607_v37 = vand.u32 2147483647, %v597_v30 }
 0xe9d   :  { %v610_v39 = vor.u32 1.1754944e-38, %v609_v36  ;;  %vm608_vm15 = vcmp.eq.f32.partialorder %v607_v37, 8.507059e+37 }
 0xea1   :  { %v841_v31 = vpop.eup %840 }
 0xea2   :  { %v599_v32 = vmul.f32 %v841_v31, %v597_v30  ;;  %vm604_vm2 = vweird.f32 %v841_v31 }
 0xea3   :  { %vm605_vm14 = vmor %vm603_vm13, %vm604_vm2 }
 0xea4   :  { %v600_v33 = vsub.f32 1.0, %v599_v32 }
 0xea6   :  { %v601_v34 = vmul.f32 %v841_v31, %v600_v33 }
 0xea8   :  { %v602_v35 = vadd.f32 %v841_v31, %v601_v34 }
 0xeaa   :  { %v606_v38 = vsel %vm605_vm14, %v841_v31, %v602_v35 }
 0xeab   :  { %v611_v41 = vsel %vm608_vm15, %v610_v39, %v606_v38 }
 0xeac   :  { %v618_v44 = vmul.f32 %v616_v43, %v611_v41 }
 0xf09   :  { %v621_v40 = vpop.permute.xlu0 %620 }
 0xf0a   :  { %v623_v42 = vmul.f32 %v621_v40, %v611_v41 }
 0xf0c   :  { %625 = vrot.lane.b32.xlu2 %v623_v42, %s854_s24 }
 0xf66   :  { %v626_v45 = vpop.permute.xlu2 %625 }
 0xf67   :  { %v628_v46 = vadd.f32 %v626_v45, %v618_v44 }
 0xf69   :  { %842 = vtanh.f32 %v628_v46  ;;  %636 = vrot.lane.b32.xlu2 %v628_v46, %s855_s3 }
 0xf6f   :  { %v843_v47 = vpop.eup %842 }
 0xf70   :  { %631 = vrot.lane.b32.xlu0 %v843_v47, %s853_s23 }
 0xfc3   :  { %v637_v48 = vpop.permute.xlu2 %636 }
 0xfc4   :  { %639 = vst.msk [vmem:[#allocation4] sm:$0xff] %vm109_vm1, %v637_v48 }
 0xfcb   :  { %v648_v51 = vld [vmem:[#allocation4] sm:$0xff] }
 0xfe2   :  { %v632_v49 = vpop.permute.xlu0 %631 }
 0xfe3   :  { %v634_v50 = vmul.f32 %v632_v49, %v611_v41 }
 0xfe5   :  { %641 = vrot.lane.b32.xlu1 %v634_v50, %s854_s24 }
 0xfed   :  { %690 = vrot.lane.b32.xlu1 %v648_v51, %s854_s24 }
0x1057   :  { %v642_v52 = vpop.permute.xlu1 %641 }
0x1058   :  { %644 = vst.msk [vmem:[#allocation3] sm:$0xff] %vm109_vm1, %v642_v52 }
0x1059   :  { %773 = vst.msk [vmem:[%s1049_s4 + $0x30] sm:$0xff] %vm109_vm1, %v642_v52 }
0x105f   :  { %v647_v53 = vld [vmem:[#allocation3] sm:$0xff]  ;;  %v691_v12 = vpop.permute.xlu1 %690 }
0x1060   :  { %v651_v54 = vpack.c.bf16 %v647_v53, %v647_v53 }
0x1062   :  { %774 = vmatmul.msk.bf16.vlgmr.msra.gmra.mxu2 %vm109_vm1, %v651_v54 }
0x10e5   :  { %v664_v57 = vpop.f32.mrf.mxu2 }
0x10e6   :  { %v668_v58 = vadd.f32 %v664_v57, %v95_v56 }
0x10e8   :  { %844 = vtanh.f32 %v668_v58  ;;  %v775_v61 = vmul.f32 -1.442695, %v668_v58 }
0x10ea   :  { %846 = vpow2.f32 %v775_v61 }
0x10ed   :  { %v666_v59 = vpop.f32.mrf.mxu2 }
0x10ee   :  { %v845_v60 = vpop.eup %844 }
0x10ef   :  { %695 = vrot.lane.b32.xlu0 %v845_v60, %s853_s23 }
0x10f0   :  { %v847_v62 = vpop.eup %846 }
0x10f1   :  { %v672_v63 = vadd.f32 1.0, %v847_v62 }
0x10f3   :  { %848 = vrcp.f32 %v672_v63  ;;  %v684_v5 = vand.u32 2147483648, %v672_v63  ;;  %vm678_vm3 = vweird.f32 %v672_v63  ;;  %v682_v8 = vand.u32 2147483647, %v672_v63 }
0x10f5   :  { %v685_v7 = vor.u32 1.1754944e-38, %v684_v5  ;;  %vm683_vm5 = vcmp.eq.f32.partialorder %v682_v8, 8.507059e+37 }
0x10f9   :  { %v849_v0 = vpop.eup %848 }
0x10fa   :  { %v674_v1 = vmul.f32 %v849_v0, %v672_v63  ;;  %vm679_vm0 = vweird.f32 %v849_v0 }
0x10fb   :  { %vm680_vm4 = vmor %vm678_vm3, %vm679_vm0 }
0x10fc   :  { %v675_v2 = vsub.f32 1.0, %v674_v1 }
0x10fe   :  { %v676_v3 = vmul.f32 %v849_v0, %v675_v2 }
0x1100   :  { %v677_v4 = vadd.f32 %v849_v0, %v676_v3 }
0x1102   :  { %v681_v6 = vsel %vm680_vm4, %v849_v0, %v677_v4 }
0x1103   :  { %v686_v10 = vsel %vm683_vm5, %v685_v7, %v681_v6 }
0x1104   :  { %v693_v13 = vmul.f32 %v691_v12, %v686_v10 }
0x1161   :  { %v696_v9 = vpop.permute.xlu0 %695 }
0x1162   :  { %v698_v11 = vmul.f32 %v696_v9, %v686_v10 }
0x1164   :  { %700 = vrot.lane.b32.xlu2 %v698_v11, %s854_s24 }
0x11be   :  { %v701_v14 = vpop.permute.xlu2 %700 }
0x11bf   :  { %v703_v15 = vadd.f32 %v701_v14, %v693_v13 }
0x11c1   :  { %850 = vtanh.f32 %v703_v15  ;;  %711 = vrot.lane.b32.xlu1 %v703_v15, %s855_s3 }
0x11c7   :  { %v851_v16 = vpop.eup %850 }
0x11c8   :  { %706 = vrot.lane.b32.xlu0 %v851_v16, %s853_s23 }
0x1233   :  { %v712_v17 = vpop.permute.xlu1 %711 }
0x1234   :  { %714 = vst.msk [vmem:[#allocation4] sm:$0xff] %vm109_vm1, %v712_v17 }
0x123a   :  { %v707_v18 = vpop.permute.xlu0 %706 }
0x123b   :  { %v709_v19 = vmul.f32 %v707_v18, %v686_v10 }
0x123d   :  { %716 = vrot.lane.b32.xlu2 %v709_v19, %s854_s24 }
0x1297   :  { %v717_v20 = vpop.permute.xlu2 %716 }
0x1298   :  { %719 = vst.msk [vmem:[#allocation3] sm:$0xff] %vm109_vm1, %v717_v20 }
0x1299   :  { %776 = vst.msk [vmem:[%s1049_s4 + $0x38] sm:$0xff] %vm109_vm1, %v717_v20 }

</bundles_post_ra>
